<compile_context>
chip_gen: v7x
topology: tpu7x:2x2x1
jax: 0.10.0
libtpu: 0.0.40
codegen_flags: <defaults>
</compile_context>

<pallas_src>
import functools

import jax
import jax.numpy as jnp
from jax.experimental import pallas as pl
from jax.experimental.pallas import tpu as pltpu


def _convlstm_gate_kernel(patch_ref, w_ref, b_ref, c_ref,
                          h_out_ref, c_out_ref, *, hidden_dim):
    """One grid step == (one batch element, one spatial tile).

    patch_ref : (1, K, TS)          im2col patches; rows are tap-major
                                    (kh, kw, cin), columns are spatial (lanes)
    w_ref     : (4*hidden, K)       flattened conv weight (tap-major columns)
    b_ref     : (4*hidden, 1)       conv bias, f32
    c_ref     : (1, hidden, TS)     current cell state, f32
    h_out_ref : (1, hidden, TS)
    c_out_ref : (1, hidden, TS)
    """
    # Single MXU matmul, f32 accumulation: (4h, K) x (K, TS) -> (4h, TS).
    cc = jnp.dot(w_ref[...], patch_ref[0],
                 preferred_element_type=jnp.float32)
    cc = cc + b_ref[...]                      # lane-broadcast bias, one VPU pass

    hd = hidden_dim
    # Sublane slices (8-aligned when hidden_dim % 8 == 0) -> free, no relayout.
    i = jax.nn.sigmoid(cc[0 * hd:1 * hd])
    f = jax.nn.sigmoid(cc[1 * hd:2 * hd])
    o = jax.nn.sigmoid(cc[2 * hd:3 * hd])
    g = jnp.tanh(cc[3 * hd:4 * hd])

    c_cur = c_ref[0]
    c_next = f * c_cur + i * g
    h_next = o * jnp.tanh(c_next)

    # Lane-dense (TS is a multiple of 128 or the full H*W) unmasked stores.
    h_out_ref[0] = h_next.astype(h_out_ref.dtype)
    c_out_ref[0] = c_next.astype(c_out_ref.dtype)


def conv_lstm_cell(input_tensor, h_cur, c_cur, weight, bias, kernel_size, *,
                   matmul_dtype=jnp.bfloat16):
    """ConvLSTMCell.forward.

    input_tensor : (B, Cin_x, H, W)                    NCHW, like PyTorch
    h_cur, c_cur : (B, hidden, H, W)                   NCHW
    weight       : (4*hidden, Cin_x+hidden, KH, KW)    PyTorch Conv2d OIHW
    bias         : (4*hidden,) or None
    returns (h_next, c_next), both (B, hidden, H, W) float32
    """
    KH, KW = kernel_size
    if KH % 2 != 1 or KW % 2 != 1:
        # PyTorch `padding = kernel_size // 2` only gives "same" output size
        # for odd kernels; guard instead of silently producing a shifted conv.
        raise ValueError("conv_lstm_cell supports odd kernel sizes only")
    ph, pw = KH // 2, KW // 2

    B, Cx, H, W = input_tensor.shape
    hidden_dim = h_cur.shape[1]
    cin = Cx + hidden_dim
    cout = 4 * hidden_dim
    HW = H * W
    K = KH * KW * cin

    if bias is None:
        bias = jnp.zeros((cout,), jnp.float32)

    # ---- spatial tile (lane axis) ---------------------------------------
    TS = HW
    for cand in (1024, 512, 256, 128):
        if HW % cand == 0:
            TS = cand
            break
    n_s = HW // TS
    # Give v7x's two TensorCores work even when B == 1.
    if B * n_s < 2 and TS % 2 == 0 and (TS // 2) % 128 == 0:
        TS //= 2
        n_s = HW // TS

    # ---- wrapper glue (XLA): NCHW-native im2col, no transposes ----------
    combined = jnp.concatenate([input_tensor, h_cur], axis=1)        # (B,cin,H,W)
    padded = jnp.pad(combined, ((0, 0), (0, 0), (ph, ph), (pw, pw)))
    patches = jnp.stack(
        [padded[:, :, kh:kh + H, kw:kw + W]
         for kh in range(KH) for kw in range(KW)],
        axis=1)                                                      # (B,KH*KW,cin,H,W)
    patches = patches.reshape(B, K, HW).astype(matmul_dtype)         # (B,K,HW)

    # OIHW -> (cout, KH, KW, cin) -> (cout, K); row ordering matches patches
    # (tap-major, then input channel).
    w2d = jnp.transpose(weight, (0, 2, 3, 1)).reshape(cout, K).astype(matmul_dtype)
    b2d = bias.reshape(cout, 1).astype(jnp.float32)
    c2d = c_cur.reshape(B, hidden_dim, HW).astype(jnp.float32)

    kernel = functools.partial(_convlstm_gate_kernel, hidden_dim=hidden_dim)

    h_next, c_next = pl.pallas_call(
        kernel,
        out_shape=(jax.ShapeDtypeStruct((B, hidden_dim, HW), jnp.float32),
                   jax.ShapeDtypeStruct((B, hidden_dim, HW), jnp.float32)),
        grid_spec=pltpu.PrefetchScalarGridSpec(
            num_scalar_prefetch=0,
            grid=(B, n_s),
            in_specs=[
                pl.BlockSpec((1, K, TS), lambda b, s: (b, 0, s)),
                # Weight/bias block index is constant -> DMA'd once, stays resident.
                pl.BlockSpec((cout, K), lambda b, s: (0, 0)),
                pl.BlockSpec((cout, 1), lambda b, s: (0, 0)),
                pl.BlockSpec((1, hidden_dim, TS), lambda b, s: (b, 0, s)),
            ],
            out_specs=[
                pl.BlockSpec((1, hidden_dim, TS), lambda b, s: (b, 0, s)),
                pl.BlockSpec((1, hidden_dim, TS), lambda b, s: (b, 0, s)),
            ],
        ),
        compiler_params=pltpu.CompilerParams(
            dimension_semantics=("parallel", "parallel")),
    )(patches, w2d, b2d, c2d)

    # (B, hidden, H*W) -> (B, hidden, H, W): pure reshape, no transpose.
    return (h_next.reshape(B, hidden_dim, H, W),
            c_next.reshape(B, hidden_dim, H, W))


def _reference(input_tensor, h_cur, c_cur, weight, bias, kernel_size):
    """Pure-JAX f32 reference matching torch semantics (NCHW conv, same pad)."""
    KH, KW = kernel_size
    combined = jnp.concatenate([input_tensor, h_cur], axis=1)
    cc = jax.lax.conv_general_dilated(
        combined, weight,
        window_strides=(1, 1),
        padding=((KH // 2, KH // 2), (KW // 2, KW // 2)),
        dimension_numbers=("NCHW", "OIHW", "NCHW"))
    cc = cc + bias[None, :, None, None]
    hd = h_cur.shape[1]
    cc_i, cc_f, cc_o, cc_g = (cc[:, 0:hd], cc[:, hd:2 * hd],
                              cc[:, 2 * hd:3 * hd], cc[:, 3 * hd:4 * hd])
    i = jax.nn.sigmoid(cc_i)
    f = jax.nn.sigmoid(cc_f)
    o = jax.nn.sigmoid(cc_o)
    g = jnp.tanh(cc_g)
    c_next = f * c_cur + i * g
    h_next = o * jnp.tanh(c_next)
    return h_next, c_next


if __name__ == "__main__":
    # Module config: input_dim=4, hidden_dim=32, kernel_size=(3,3), bias=True
    B, Cx, H, W = 2, 4, 16, 16
    hidden_dim = 32
    kernel_size = (3, 3)
    cin = Cx + hidden_dim
    cout = 4 * hidden_dim

    key = jax.random.PRNGKey(0)
    kx, kh, kc, kw_, kb = jax.random.split(key, 5)

    x = jax.random.normal(kx, (B, Cx, H, W), jnp.float32)
    h0 = jax.random.normal(kh, (B, hidden_dim, H, W), jnp.float32)
    c0 = jax.random.normal(kc, (B, hidden_dim, H, W), jnp.float32)

    # Deterministic synthetic Conv2d params (PyTorch layout OIHW).
    fan_in = cin * kernel_size[0] * kernel_size[1]
    weight = jax.random.normal(kw_, (cout, cin) + kernel_size,
                               jnp.float32) / jnp.sqrt(fan_in)
    bias = jax.random.normal(kb, (cout,), jnp.float32) * 0.01

    h_ref, c_ref = _reference(x, h0, c0, weight, bias, kernel_size)

    # Default (performance) path: bf16 matmul operands, f32 accumulation.
    h_next, c_next = conv_lstm_cell(x, h0, c0, weight, bias, kernel_size)
    jax.block_until_ready((h_next, c_next))
    # Tolerance loosened because conv operands are rounded to bf16
    # (accumulation and gate math stay f32).
    assert jnp.allclose(h_next, h_ref, atol=5e-2, rtol=5e-2)
    assert jnp.allclose(c_next, c_ref, atol=5e-2, rtol=5e-2)

    # f32-operand path: validates exact PyTorch semantics tightly.
    h32, c32 = conv_lstm_cell(x, h0, c0, weight, bias, kernel_size,
                              matmul_dtype=jnp.float32)
    jax.block_until_ready((h32, c32))
    assert jnp.allclose(h32, h_ref, atol=1e-4, rtol=1e-4)
    assert jnp.allclose(c32, c_ref, atol=1e-4, rtol=1e-4)

    print("KERNEL_OK")
</pallas_src>

<mosaic_0001>
module attributes {stable_mosaic.version = 11 : i64} {
  func.func @_convlstm_gate_kernel(%arg0: i32, %arg1: i32, %arg2: memref<1x324x256xbf16, #tpu.memory_space<vmem>>, %arg3: memref<128x324xbf16, #tpu.memory_space<vmem>>, %arg4: memref<128x1xf32, #tpu.memory_space<vmem>>, %arg5: memref<1x32x256xf32, #tpu.memory_space<vmem>>, %arg6: memref<1x32x256xf32, #tpu.memory_space<vmem>>, %arg7: memref<1x32x256xf32, #tpu.memory_space<vmem>>) attributes {dimension_semantics = [#tpu.dimension_semantics<parallel>, #tpu.dimension_semantics<parallel>], iteration_bounds = array<i64: 2, 1>, scalar_prefetch = 0 : i64, scratch_operands = 0 : i64, tpu.core_type = #tpu.core_type<tc>, window_params = [{transform_indices = @transform_0, window_bounds = array<i64: 1, 324, 256>}, {pipeline_mode = #tpu.pipeline_mode<synchronous>, transform_indices = @transform_1, window_bounds = array<i64: 128, 324>}, {pipeline_mode = #tpu.pipeline_mode<synchronous>, transform_indices = @transform_2, window_bounds = array<i64: 128, 1>}, {transform_indices = @transform_3, window_bounds = array<i64: 1, 32, 256>}, {transform_indices = @transform_4, window_bounds = array<i64: 1, 32, 256>}, {transform_indices = @transform_5, window_bounds = array<i64: 1, 32, 256>}]} {
    %c0 = arith.constant 0 : index
    %c0_0 = arith.constant 0 : index
    %0 = vector.load %arg3[%c0, %c0_0] : memref<128x324xbf16, #tpu.memory_space<vmem>>, vector<128x324xbf16>
    %c0_1 = arith.constant 0 : index
    %c0_2 = arith.constant 0 : index
    %c0_3 = arith.constant 0 : index
    %1 = vector.load %arg2[%c0_1, %c0_2, %c0_3] : memref<1x324x256xbf16, #tpu.memory_space<vmem>>, vector<1x324x256xbf16>
    %2 = vector.shape_cast %1 : vector<1x324x256xbf16> to vector<324x256xbf16>
    %cst = arith.constant dense<0.000000e+00> : vector<128x256xf32>
    %3 = tpu.matmul %0, %2, %cst {dimension_numbers = #tpu.dot_dimension_numbers<[1], [0], [0], [1], [0, 0, 1, 1], [], []>} : vector<128x324xbf16>, vector<324x256xbf16>, vector<128x256xf32> -> vector<128x256xf32>
    %c0_4 = arith.constant 0 : index
    %c0_5 = arith.constant 0 : index
    %4 = vector.load %arg4[%c0_4, %c0_5] : memref<128x1xf32, #tpu.memory_space<vmem>>, vector<128x1xf32>
    %5 = vector.broadcast %4 : vector<128x1xf32> to vector<128x256xf32>
    %6 = arith.addf %3, %5 : vector<128x256xf32>
    %7 = vector.extract_strided_slice %6 {offsets = [0, 0], sizes = [32, 256], strides = [1, 1]} : vector<128x256xf32> to vector<32x256xf32>
    %8 = arith.negf %7 : vector<32x256xf32>
    %9 = math.exp %8 : vector<32x256xf32>
    %cst_6 = arith.constant 1.000000e+00 : f32
    %10 = vector.broadcast %cst_6 : f32 to vector<32x256xf32>
    %11 = arith.addf %10, %9 : vector<32x256xf32>
    %12 = arith.divf %10, %11 : vector<32x256xf32>
    %13 = vector.extract_strided_slice %6 {offsets = [32, 0], sizes = [32, 256], strides = [1, 1]} : vector<128x256xf32> to vector<32x256xf32>
    %14 = arith.negf %13 : vector<32x256xf32>
    %15 = math.exp %14 : vector<32x256xf32>
    %cst_7 = arith.constant 1.000000e+00 : f32
    %16 = vector.broadcast %cst_7 : f32 to vector<32x256xf32>
    %17 = arith.addf %16, %15 : vector<32x256xf32>
    %18 = arith.divf %16, %17 : vector<32x256xf32>
    %19 = vector.extract_strided_slice %6 {offsets = [64, 0], sizes = [32, 256], strides = [1, 1]} : vector<128x256xf32> to vector<32x256xf32>
    %20 = arith.negf %19 : vector<32x256xf32>
    %21 = math.exp %20 : vector<32x256xf32>
    %cst_8 = arith.constant 1.000000e+00 : f32
    %22 = vector.broadcast %cst_8 : f32 to vector<32x256xf32>
    %23 = arith.addf %22, %21 : vector<32x256xf32>
    %24 = arith.divf %22, %23 : vector<32x256xf32>
    %25 = vector.extract_strided_slice %6 {offsets = [96, 0], sizes = [32, 256], strides = [1, 1]} : vector<128x256xf32> to vector<32x256xf32>
    %26 = math.tanh %25 : vector<32x256xf32>
    %c0_9 = arith.constant 0 : index
    %c0_10 = arith.constant 0 : index
    %c0_11 = arith.constant 0 : index
    %27 = vector.load %arg5[%c0_9, %c0_10, %c0_11] : memref<1x32x256xf32, #tpu.memory_space<vmem>>, vector<1x32x256xf32>
    %28 = vector.shape_cast %27 : vector<1x32x256xf32> to vector<32x256xf32>
    %29 = arith.mulf %18, %28 : vector<32x256xf32>
    %30 = arith.mulf %12, %26 : vector<32x256xf32>
    %31 = arith.addf %29, %30 : vector<32x256xf32>
    %32 = math.tanh %31 : vector<32x256xf32>
    %33 = arith.mulf %24, %32 : vector<32x256xf32>
    %c0_12 = arith.constant 0 : index
    %c0_13 = arith.constant 0 : index
    %c0_14 = arith.constant 0 : index
    %34 = vector.load %arg6[%c0_12, %c0_13, %c0_14] : memref<1x32x256xf32, #tpu.memory_space<vmem>>, vector<1x32x256xf32>
    %35 = vector.shape_cast %34 : vector<1x32x256xf32> to vector<32x256xf32>
    %36 = vector.shape_cast %33 : vector<32x256xf32> to vector<1x32x256xf32>
    tpu.vector_store %arg6[%c0_12, %c0_13, %c0_14], %36 {strides = array<i32>} : memref<1x32x256xf32, #tpu.memory_space<vmem>>, vector<1x32x256xf32>,
    %c0_15 = arith.constant 0 : index
    %c0_16 = arith.constant 0 : index
    %c0_17 = arith.constant 0 : index
    %37 = vector.load %arg7[%c0_15, %c0_16, %c0_17] : memref<1x32x256xf32, #tpu.memory_space<vmem>>, vector<1x32x256xf32>
    %38 = vector.shape_cast %37 : vector<1x32x256xf32> to vector<32x256xf32>
    %39 = vector.shape_cast %31 : vector<32x256xf32> to vector<1x32x256xf32>
    tpu.vector_store %arg7[%c0_15, %c0_16, %c0_17], %39 {strides = array<i32>} : memref<1x32x256xf32, #tpu.memory_space<vmem>>, vector<1x32x256xf32>,
    return
  }
  func.func @transform_0(%arg0: i32, %arg1: i32) -> (i32, i32, i32) {
    %c0_i32 = arith.constant 0 : i32
    %c0_i32_0 = arith.constant 0 : i32
    return %arg0, %c0_i32, %arg1 : i32, i32, i32
  }
  func.func @transform_1(%arg0: i32, %arg1: i32) -> (i32, i32) {
    %c0_i32 = arith.constant 0 : i32
    %c0_i32_0 = arith.constant 0 : i32
    %c0_i32_1 = arith.constant 0 : i32
    return %c0_i32, %c0_i32_0 : i32, i32
  }
  func.func @transform_2(%arg0: i32, %arg1: i32) -> (i32, i32) {
    %c0_i32 = arith.constant 0 : i32
    %c0_i32_0 = arith.constant 0 : i32
    %c0_i32_1 = arith.constant 0 : i32
    return %c0_i32, %c0_i32_0 : i32, i32
  }
  func.func @transform_3(%arg0: i32, %arg1: i32) -> (i32, i32, i32) {
    %c0_i32 = arith.constant 0 : i32
    %c0_i32_0 = arith.constant 0 : i32
    return %arg0, %c0_i32, %arg1 : i32, i32, i32
  }
  func.func @transform_4(%arg0: i32, %arg1: i32) -> (i32, i32, i32) {
    %c0_i32 = arith.constant 0 : i32
    %c0_i32_0 = arith.constant 0 : i32
    return %arg0, %c0_i32, %arg1 : i32, i32, i32
  }
  func.func @transform_5(%arg0: i32, %arg1: i32) -> (i32, i32, i32) {
    %c0_i32 = arith.constant 0 : i32
    %c0_i32_0 = arith.constant 0 : i32
    return %arg0, %c0_i32, %arg1 : i32, i32, i32
  }
}

</mosaic_0001>

<bundles_post_ra>
// kernel: tpu_custom_call.1
= control target key start
LH: loop header
LB: loop body
LE: loop exit
PB: predicated region body
PF: predicated region fallthrough
CT: control target
= control target key end

     0   :  { %11 = vsyncpa [#allocation3], 0  ;;  %s2557_s0 = inlined_call_operand.vmem [shape: bf16[2,324,256], index: 0, kind: input, shape index: {}]   ;;  %s2558_s1 = inlined_call_operand.vmem [shape: bf16[128,324], index: 1, kind: input, shape index: {}]   ;;  %s2559_s2 = inlined_call_operand.vmem [shape: f32[128,1], index: 2, kind: input, shape index: {}]   ;;  %s2560_s3 = inlined_call_operand.vmem [shape: f32[2,32,256], index: 3, kind: input, shape index: {}]   ;;  %s2561_s4 = inlined_call_operand.hbm [shape: f32[2,32,256], index: 4, kind: output, shape index: {0}]   ;;  %s2562_s5 = inlined_call_operand.hbm [shape: f32[2,32,256], index: 5, kind: output, shape index: {1}]  }
   0x1   :  { %13 = vsyncpa [#allocation3 + $0x1], 0 }
   0x2   :  { %14 = vsyncpa [#allocation5], 0 }
   0x3   :  { %16 = vsyncpa [#allocation5 + $0x1], 0  ;;  %s2063_s18 = smov 0   ;;  %s2065_s19 = smov 0  }
   0x4   :  { %s2067_s20 = smov 0   ;;  %s2069_s21 = smov 0  }
   0x5   :  { %s2071_s22 = smov 0   ;;  %s2073_s23 = smov 0  }
   0x6 LB: > { %s1444_s24 = sadd.s32 4294967295, %s2026_s23   ;;  %s1445_s25 = sadd.s32 4294967294, %s2026_s23   ;;  %s2026_s23 = sphi %s2073_s23, %s22_s23   ;;  %s2022_s22 = sphi %s2071_s22, %s2569_s22   ;;  %s2018_s21 = sphi %s2069_s21, %s2568_s21   ;;  %s2014_s20 = sphi %s2067_s20, %s2567_s20   ;;  %s2010_s19 = sphi %s2065_s19, %s2566_s19   ;;  %s2006_s18 = sphi %s2063_s18, %s2565_s18  }
   0x7   : > { %s34_s26 = sadd.s32 1, %s2022_s22  ;;  %s141_s27 = sadd.s32 1, %s2014_s20 }
   0x8   : > { %p36_p0 = scmp.ge.s32.totalorder %s34_s26, 2  ;;  %p151_p1 = scmp.ne.s32.totalorder %s2014_s20, %s2010_s19 }
   0x9   : > { %p152_p2 = scmp.eq.s32.totalorder %s1444_s24, 1  ;;  %p157_p3 = scmp.ne.s32.totalorder %s2010_s19, %s2006_s18 }
   0xa   : > { %s2571_s26 = smov (%p36_p0, %s34_s26), 0  ;;  %p158_p5 = scmp.eq.s32.totalorder %s1445_s25, 1 }
   0xb   : > { %p2103_p4 = por %p152_p2, %p151_p1  ;;  %s136_s29 = ssub.s32 %s2022_s22, %s2571_s26 }
   0xc   : > { %p1448_p6 = scmp.ge.s32.totalorder %s2026_s23, 1  ;;  %p139_p7 = scmp.eq.s32.totalorder %s136_s29, 0 }
   0xd   : > { %p2110_p8 = por %p158_p5, %p157_p3  ;;  %p236_p9 = scmp.lt.s32.totalorder %s2026_s23, 3 }
   0xe   : > { %s2116_s6 = scalar_select %p139_p7, %s2014_s20, %s141_s27  }
   0xf   : > { %p237_p10 = pnand %p1448_p6, %p236_p9 }
  0x10   : > { %p283_p11 = scmp.lt.s32.totalorder (!%p237_p10), %s2018_s21, 1  ;;  %v2028_v0 = vmov (!%p237_p10), 0   ;;  %v1758_v1 = vld [vmem:[%s2558_s1 + $0x4] ss:$12 sps:$4 sm:$0xff] (!%p237_p10)   ;;  %vm824_vm0 = vcmask (!%p237_p10), 1041408   ;;  %vm799_vm1 = vcmask (!%p237_p10), 556032  }
  0x11   : > { %240 = sbr.rel (%p237_p10) target bundleno = 429 (0x1ad), region = 36  ;;  %976 = vmatprep.mubr.bf16.mxu0 (!%p237_p10), %v2028_v0  ;;  %1692 = vset.pattern.permute.xlu0 (!%p237_p10), %v2028_v0  ;;  %v1759_v33 = vld [vmem:[%s2558_s1 + $0x8] ss:$12 sps:$4 sm:$0xff] (!%p237_p10)   ;;  %v378_v37 = vld [vmem:[%s2559_s2] sm:$0xff] (!%p237_p10)  ;;  %v381_v42 = vld [vmem:[%s2559_s2 + $0x18] sm:$0xff] (!%p237_p10)  ;;  %s1562_s16 = sshll.u32 (!%p237_p10), %s2018_s21, 10 }
  0x12   : > { %1693 = vset.pattern.permute.xlu1 (!%p237_p10), %v2028_v0  ;;  %863 = vmatprep.mubr.bf16.mxu1 (!%p237_p10), %v1758_v1  ;;  %v380_v38 = vld [vmem:[%s2559_s2 + $0x10] sm:$0xff] (!%p237_p10)  ;;  %v1762_v40 = vld [vmem:[%s2558_s1 + $0x20] ss:$12 sps:$4 sm:$0xff] (!%p237_p10)   ;;  %v1766_v49 = vld [vmem:[%s2558_s1 + $0x38] ss:$12 sps:$4 sm:$0xff] (!%p237_p10)   ;;  %s2459_s29 = scalar_lea.hbm (!%p237_p10), %s2562_s5, %s1562_s16 }
  0x13   : > { %396 = vperm.xlu0 (!%p237_p10), %1692, %v378_v37   ;;  %v379_v41 = vld [vmem:[%s2559_s2 + $0x8] sm:$0xff] (!%p237_p10)  ;;  %406 = vperm.xlu1 (!%p237_p10), %1693, %v380_v38   ;;  %v382_v45 = vld [vmem:[%s2559_s2 + $0x20] sm:$0xff] (!%p237_p10)  ;;  %v384_v50 = vld [vmem:[%s2559_s2 + $0x30] sm:$0xff] (!%p237_p10) }
  0x14   : > { %v383_v46 = vld [vmem:[%s2559_s2 + $0x28] sm:$0xff] (!%p237_p10)  ;;  %v385_v51 = vld [vmem:[%s2559_s2 + $0x38] sm:$0xff] (!%p237_p10)  ;;  %v386_v54 = vld [vmem:[%s2559_s2 + $0x40] sm:$0xff] (!%p237_p10) }
  0x15   : > { %v387_v55 = vld [vmem:[%s2559_s2 + $0x48] sm:$0xff] (!%p237_p10)  ;;  %v1770_v58 = vld [vmem:[%s2558_s1 + $0x50] ss:$12 sps:$4 sm:$0xff] (!%p237_p10)   ;;  %v390_v62 = vld [vmem:[%s2559_s2 + $0x60] sm:$0xff] (!%p237_p10) }
  0x16   : > { %v388_v59 = vld [vmem:[%s2559_s2 + $0x50] sm:$0xff] (!%p237_p10)  ;;  %v389_v60 = vld [vmem:[%s2559_s2 + $0x58] sm:$0xff] (!%p237_p10)  ;;  %v1756_v63 = vld [vmem:[%s2558_s1] ss:$12 sps:$4 sm:$0xff] (!%p237_p10)  }
  0x17   : > { %401 = vperm.xlu0 (!%p237_p10), %1692, %v379_v41   ;;  %411 = vperm.xlu1 (!%p237_p10), %1693, %v381_v42   ;;  %v391_v1 = vld [vmem:[%s2559_s2 + $0x68] sm:$0xff] (!%p237_p10) }
  0x18   : > { %s2125_s9 = scalar_select %p283_p11, %s2018_s21, 1 }
  0x1a   : > { %s1628_s10 = smul.u32 328, %s2125_s9 }
  0x1b   : > { %416 = vperm.xlu0 %1692, %v382_v45   ;;  %421 = vperm.xlu1 %1693, %v383_v46  }
  0x1c   : > { %s2132_s13 = scalar_lea.vmem %s2557_s0, %s1628_s10  ;;  %s1561_s10 = sshll.u32 %s2125_s9, 6 }
  0x1d   : > { %v1694_v2 = vld [vmem:[%s2132_s13 + $0x4] ss:$8 sps:$4 sm:$0xff]   ;;  %v1696_v3 = vld [vmem:[%s2132_s13] ss:$8 sps:$4 sm:$0xff]   ;;  %v1697_v4 = vld [vmem:[%s2132_s13 + $0x14] ss:$8 sps:$4 sm:$0xff]   ;;  %s2398_s12 = scalar_lea.vmem %s2560_s3, %s1561_s10 }
  0x1e   : > { %831 = vmatprep.subr.bf16.mxu1 %v1694_v2  ;;  %v1699_v5 = vld [vmem:[%s2132_s13 + $0x10] ss:$8 sps:$4 sm:$0xff]   ;;  %v1700_v6 = vld [vmem:[%s2132_s13 + $0x24] ss:$8 sps:$4 sm:$0xff]   ;;  %v1702_v7 = vld [vmem:[%s2132_s13 + $0x20] ss:$8 sps:$4 sm:$0xff]  }
  0x1f   : > { %832 = vmatpush1.bf16.msra.mxu1 %v1696_v3  ;;  %v1703_v8 = vld [vmem:[%s2132_s13 + $0x34] ss:$8 sps:$4 sm:$0xff]   ;;  %v1705_v9 = vld [vmem:[%s2132_s13 + $0x30] ss:$8 sps:$4 sm:$0xff]   ;;  %v1706_v10 = vld [vmem:[%s2132_s13 + $0x44] ss:$8 sps:$4 sm:$0xff]   ;;  %426 = vperm.xlu0 %1692, %v384_v50  }
  0x20   : > { %833 = vmatprep.subr.bf16.mxu1 %v1697_v4  ;;  %v1708_v11 = vld [vmem:[%s2132_s13 + $0x40] ss:$8 sps:$4 sm:$0xff]   ;;  %v1727_v12 = vld [vmem:[%s2132_s13 + $0x104] ss:$8 sps:$4 sm:$0xff]   ;;  %v1709_v13 = vld [vmem:[%s2132_s13 + $0x54] ss:$8 sps:$4 sm:$0xff]   ;;  %431 = vperm.xlu1 %1693, %v385_v51  }
  0x21   : > { %v1731_v14 = vld [vmem:[%s2132_s13 + $0x100] ss:$8 sps:$4 sm:$0xff]   ;;  %944 = vmatprep.subr.bf16.mxu0 %v1727_v12  ;;  %v1733_v15 = vld [vmem:[%s2132_s13 + $0x114] ss:$8 sps:$4 sm:$0xff]   ;;  %v1711_v16 = vld [vmem:[%s2132_s13 + $0x50] ss:$8 sps:$4 sm:$0xff]  }
  0x22   : > { %945 = vmatpush1.bf16.msra.mxu0 %v1731_v14  ;;  %v1712_v17 = vld [vmem:[%s2132_s13 + $0x64] ss:$8 sps:$4 sm:$0xff]   ;;  %v1737_v18 = vld [vmem:[%s2132_s13 + $0x110] ss:$8 sps:$4 sm:$0xff]   ;;  %v1714_v20 = vld [vmem:[%s2132_s13 + $0x60] ss:$8 sps:$4 sm:$0xff]  }
  0x23   : > { %834 = vmatpush1.bf16.msra.mxu1 %v1699_v5  ;;  %946 = vmatprep.subr.bf16.mxu0 %v1733_v15  ;;  %v1739_v19 = vld [vmem:[%s2132_s13 + $0x124] ss:$8 sps:$4 sm:$0xff]   ;;  %v1743_v21 = vld [vmem:[%s2132_s13 + $0x120] ss:$8 sps:$4 sm:$0xff]   ;;  %v1745_v22 = vld [vmem:[%s2132_s13 + $0x134] ss:$8 sps:$4 sm:$0xff]  }
  0x24   : > { %835 = vmatprep.subr.bf16.mxu1 %v1700_v6  ;;  %v1715_v23 = vld [vmem:[%s2132_s13 + $0x74] ss:$8 sps:$4 sm:$0xff]   ;;  %v377_v24 = vld [vmem:[%s2132_s13 + $0x140] sm:$0x33]  ;;  %v1749_v25 = vld [vmem:[%s2132_s13 + $0x130] ss:$8 sps:$4 sm:$0xff]   ;;  %436 = vperm.xlu0 %1692, %v386_v54  }
  0x25   : > { %v1717_v26 = vld [vmem:[%s2132_s13 + $0x70] ss:$8 sps:$4 sm:$0xff]   ;;  %v1519_v27 = vcombine.high %v377_v24, %v377_v24  ;;  %v1518_v28 = vcombine.low %v377_v24, %v377_v24  ;;  %v1718_v29 = vld [vmem:[%s2132_s13 + $0x84] ss:$8 sps:$4 sm:$0xff]   ;;  %v1720_v30 = vld [vmem:[%s2132_s13 + $0x80] ss:$8 sps:$4 sm:$0xff]   ;;  %441 = vperm.xlu1 %1693, %v387_v55  }
  0x26   : > { %947 = vmatpush1.bf16.msra.mxu0 %v1737_v18  ;;  %v1721_v32 = vld [vmem:[%s2132_s13 + $0x94] ss:$8 sps:$4 sm:$0xff]   ;;  %v1723_v34 = vld [vmem:[%s2132_s13 + $0x90] ss:$8 sps:$4 sm:$0xff]   ;;  %v1724_v35 = vld [vmem:[%s2132_s13 + $0xa4] ss:$8 sps:$4 sm:$0xff]  }
  0x27   : > { %836 = vmatpush1.bf16.msra.mxu1 %v1702_v7  ;;  %948 = vmatprep.subr.bf16.mxu0 %v1739_v19  ;;  %v826_v31 = vsel %vm824_vm0, %v1518_v28, 0  ;;  %v1726_v36 = vld [vmem:[%s2132_s13 + $0xa0] ss:$8 sps:$4 sm:$0xff]   ;;  %v1729_v39 = vld [vmem:[%s2132_s13 + $0xb4] ss:$8 sps:$4 sm:$0xff]   ;;  %s2401_s9 = sand.u32 1, %s2010_s19  }
  0x28   : > { %837 = vmatprep.subr.bf16.mxu1 %v1703_v8  ;;  %v1732_v43 = vld [vmem:[%s2132_s13 + $0xb0] ss:$8 sps:$4 sm:$0xff]   ;;  %v1735_v44 = vld [vmem:[%s2132_s13 + $0xc4] ss:$8 sps:$4 sm:$0xff]   ;;  %v1738_v47 = vld [vmem:[%s2132_s13 + $0xc0] ss:$8 sps:$4 sm:$0xff]   ;;  %446 = vperm.xlu0 %1692, %v388_v59  }
  0x29   : > { %v1741_v48 = vld [vmem:[%s2132_s13 + $0xd4] ss:$8 sps:$4 sm:$0xff]   ;;  %v1744_v52 = vld [vmem:[%s2132_s13 + $0xd0] ss:$8 sps:$4 sm:$0xff]   ;;  %v1747_v53 = vld [vmem:[%s2132_s13 + $0xe4] ss:$8 sps:$4 sm:$0xff]   ;;  %451 = vperm.xlu1 %1693, %v389_v60  }
  0x2a   : > { %949 = vmatpush1.bf16.msra.mxu0 %v1743_v21  ;;  %v1750_v56 = vld [vmem:[%s2132_s13 + $0xe0] ss:$8 sps:$4 sm:$0xff]   ;;  %v1752_v57 = vld [vmem:[%s2132_s13 + $0xf4] ss:$8 sps:$4 sm:$0xff]   ;;  %v1755_v61 = vld [vmem:[%s2132_s13 + $0xf0] ss:$8 sps:$4 sm:$0xff]  }
  0x2b   : > { %838 = vmatpush1.bf16.msra.mxu1 %v1705_v9  ;;  %950 = vmatprep.subr.bf16.mxu0 %v1745_v22  ;;  %v1760_v2 = vld [vmem:[%s2558_s1 + $0x1c] ss:$12 sps:$4 sm:$0xff]   ;;  %v392_v4 = vld [vmem:[%s2559_s2 + $0x70] sm:$0xff]  ;;  %v1763_v6 = vld [vmem:[%s2558_s1 + $0x18] ss:$12 sps:$4 sm:$0xff]   ;;  %s1449_s14 = sshll.u32 %s2401_s9, 6 }
  0x2c   : > { %839 = vmatprep.subr.bf16.mxu1 %v1706_v10  ;;  %456 = vperm.xlu0 %1692, %v390_v62   ;;  %v1774_v3 = vld [vmem:[%s2558_s1 + $0x68] ss:$12 sps:$4 sm:$0xff]   ;;  %v393_v5 = vld [vmem:[%s2559_s2 + $0x78] sm:$0xff]  ;;  %v1778_v8 = vld [vmem:[%s2558_s1 + $0x80] ss:$12 sps:$4 sm:$0xff]   ;;  %s2421_s15 = scalar_lea.vmem [#allocation4], %s1449_s14 }
  0x2d   : > { %461 = vperm.xlu1 %1693, %v391_v1   ;;  %v1764_v7 = vld [vmem:[%s2558_s1 + $0x34] ss:$12 sps:$4 sm:$0xff]   ;;  %v1767_v9 = vld [vmem:[%s2558_s1 + $0x30] ss:$12 sps:$4 sm:$0xff]   ;;  %v1768_v10 = vld [vmem:[%s2558_s1 + $0x4c] ss:$12 sps:$4 sm:$0xff]  }
  0x2e   : > { %951 = vmatpush1.bf16.msra.mxu0 %v1749_v25  ;;  %v1771_v12 = vld [vmem:[%s2558_s1 + $0x48] ss:$12 sps:$4 sm:$0xff]   ;;  %v1786_v14 = vld [vmem:[%s2558_s1 + $0xb0] ss:$12 sps:$4 sm:$0xff]   ;;  %v1775_v15 = vld [vmem:[%s2558_s1 + $0x60] ss:$12 sps:$4 sm:$0xff]  }
  0x2f   : > { %840 = vmatpush1.bf16.msra.mxu1 %v1708_v11  ;;  %1520 = vmatprep.subr.msk.bf16.mxu0 %vm824_vm0, %v1519_v27  ;;  %v1782_v11 = vld [vmem:[%s2558_s1 + $0x98] ss:$12 sps:$4 sm:$0xff]   ;;  %v1783_v18 = vld [vmem:[%s2558_s1 + $0x90] ss:$12 sps:$4 sm:$0xff]   ;;  %s1312_s17 = sshll.u32 %s2421_s15, 4  ;;  %s2449_s24 = scalar_lea.vmem [#allocation2], %s1449_s14  ;;  %s2461_s17 = int_to_ptr.vmem [resolvable:$true] %s1312_s17 }
  0x30   : > { %841 = vmatprep.subr.bf16.mxu1 %v1709_v13  ;;  %466 = vperm.xlu0 %1692, %v392_v4   ;;  %v1772_v13 = vld [vmem:[%s2558_s1 + $0x64] ss:$12 sps:$4 sm:$0xff]   ;;  %v1784_v19 = vld [vmem:[%s2558_s1 + $0xac] ss:$12 sps:$4 sm:$0xff]   ;;  %s1279_s7 = scalar_lea.sflag [#allocation5], %s2401_s9  ;;  %s1916_s8 = scalar_lea.vmem %s2461_s17, 1024 }
  0x31   : > { %471 = vperm.xlu1 %1693, %v393_v5   ;;  %p1917_p12 = scmp.ne.s32.totalorder %s2461_s17, %s1916_s8  ;;  %s2029_s10 = smov [#allocation4]  }
  0x32   : > { %953 = vmatpush1.bf16.msra.mxu0 %v826_v31  ;;  %s1920_s11 = sshll.u32 %s2029_s10, 4  ;;  %s1921_s11 = int_to_ptr.vmem [resolvable:$false] %s1920_s11 }
  0x33   : > { %842 = vmatpush1.bf16.msra.mxu1 %v1711_v16  ;;  %v1779_v16 = vld [vmem:[%s2558_s1 + $0x78] ss:$12 sps:$4 sm:$0xff]   ;;  %p1918_p13 = pnand %p1917_p12, %p2103_p4  ;;  %s1922_s13 = scalar_lea.vmem %s1921_s11, 2048 }
  0x34   : > { %843 = vmatprep.subr.bf16.mxu1 %v1712_v17  ;;  %v1780_v17 = vld [vmem:[%s2558_s1 + $0x94] ss:$12 sps:$4 sm:$0xff]   ;;  %p1923_p1 = scmp.lt.s32.totalorder %s2461_s17, %s1921_s11  ;;  %p1924_p2 = scmp.lt.s32.totalorder %s1922_s13, %s1916_s8 }
  0x35   : > { %1521 = vmatmul.mubr.msk.bf16.vlgmr.msra.gmra.mrb[0].mxu0 %vm799_vm1, %v1759_v33  ;;  %p1919_p0 = pneg %p1918_p13 }
  0x36   : > { %986 = vmatprep.mubr.bf16.mxu0 %v2028_v0  ;;  %p1925_p3 = por %p1924_p2, %p1923_p1 }
  0x37   : > { %844 = vmatpush1.bf16.msra.mxu1 %v1714_v20  ;;  %v1787_v20 = vld [vmem:[%s2558_s1 + $0xa8] ss:$12 sps:$4 sm:$0xff]  }
  0x38   : > { %845 = vmatprep.subr.bf16.mxu1 %v1715_v23  ;;  %p1926_p5 = pnand %p1925_p3, %p1919_p0 }
  0x3b   : > { %846 = vmatpush1.bf16.msra.mxu1 %v1717_v26 }
  0x3c   : > { %847 = vmatprep.subr.bf16.mxu1 %v1718_v29 }
  0x3d   : > { %1522 = vmatmul.mubr.msk.bf16.gmra.mrb[4].mxu0 %vm799_vm1, %v1762_v40 }
  0x3e   : > { %996 = vmatprep.mubr.bf16.mxu0 %v2028_v0 }
  0x3f   : > { %848 = vmatpush1.bf16.msra.mxu1 %v1720_v30 }
  0x40   : > { %849 = vmatprep.subr.bf16.mxu1 %v1721_v32 }
  0x43   : > { %850 = vmatpush1.bf16.msra.mxu1 %v1723_v34 }
  0x44   : > { %851 = vmatprep.subr.bf16.mxu1 %v1724_v35 }
  0x45   : > { %1523 = vmatmul.mubr.msk.bf16.gmra.mrb[8].mxu0 %vm799_vm1, %v1766_v49 }
  0x46   : > { %1006 = vmatprep.mubr.bf16.mxu0 %v2028_v0 }
  0x47   : > { %852 = vmatpush1.bf16.msra.mxu1 %v1726_v36 }
  0x48   : > { %853 = vmatprep.subr.bf16.mxu1 %v1729_v39 }
  0x4b   : > { %854 = vmatpush1.bf16.msra.mxu1 %v1732_v43 }
  0x4c   : > { %855 = vmatprep.subr.bf16.mxu1 %v1735_v44 }
  0x4d   : > { %1524 = vmatmul.mubr.msk.bf16.gmra.mrb[12].mxu0 %vm799_vm1, %v1770_v58 }
  0x4e   : > { %1016 = vmatprep.mubr.bf16.mxu0 %v2028_v0 }
  0x4f   : > { %856 = vmatpush1.bf16.msra.mxu1 %v1738_v47 }
  0x50   : > { %857 = vmatprep.subr.bf16.mxu1 %v1741_v48 }
  0x53   : > { %858 = vmatpush1.bf16.msra.mxu1 %v1744_v52 }
  0x54   : > { %859 = vmatprep.subr.bf16.mxu1 %v1747_v53 }
  0x55   : > { %1525 = vmatmul.mubr.msk.bf16.gmra.mrb[16].mxu0 %vm799_vm1, %v1774_v3 }
  0x56   : > { %1026 = vmatprep.mubr.bf16.mxu0 %v2028_v0 }
  0x57   : > { %860 = vmatpush1.bf16.msra.mxu1 %v1750_v56 }
  0x58   : > { %861 = vmatprep.subr.bf16.mxu1 %v1752_v57 }
  0x5b   : > { %862 = vmatpush1.bf16.msra.mxu1 %v1755_v61 }
  0x5d   : > { %1526 = vmatmul.mubr.msk.bf16.gmra.mrb[20].mxu0 %vm799_vm1, %v1778_v8 }
  0x5e   : > { %864 = vmatmul.mubr.bf16.vlgmr.msra.gmra.mrb[0].mxu1 %v1756_v63  ;;  %1036 = vmatprep.mubr.bf16.mxu0 %v2028_v0 }
  0x5f   : > { %873 = vmatprep.mubr.bf16.mxu1 %v1760_v2 }
  0x65   : > { %1527 = vmatmul.mubr.msk.bf16.gmra.mrb[24].mxu0 %vm799_vm1, %v1782_v11 }
  0x66   : > { %874 = vmatmul.mubr.bf16.gmra.mrb[4].mxu1 %v1763_v6  ;;  %1046 = vmatprep.mubr.bf16.mxu0 %v2028_v0  ;;  %v1776_v0 = vld [vmem:[%s2558_s1 + $0x7c] ss:$12 sps:$4 sm:$0xff]  }
  0x67   : > { %883 = vmatprep.mubr.bf16.mxu1 %v1764_v7 }
  0x6d   : > { %1528 = vmatmul.mubr.msk.bf16.gmra.mrb[28].mxu0 %vm799_vm1, %v1786_v14 }
  0x6e   : > { %884 = vmatmul.mubr.bf16.gmra.mrb[8].mxu1 %v1767_v9 }
  0x6f   : > { %893 = vmatprep.mubr.bf16.mxu1 %v1768_v10 }
  0x76   : > { %894 = vmatmul.mubr.bf16.gmra.mrb[12].mxu1 %v1771_v12 }
  0x77   : > { %903 = vmatprep.mubr.bf16.mxu1 %v1772_v13 }
  0x7e   : > { %904 = vmatmul.mubr.bf16.gmra.mrb[16].mxu1 %v1775_v15 }
  0x7f   : > { %913 = vmatprep.mubr.bf16.mxu1 %v1776_v0 }
  0x86   : > { %914 = vmatmul.mubr.bf16.gmra.mrb[20].mxu1 %v1779_v16 }
  0x87   : > { %923 = vmatprep.mubr.bf16.mxu1 %v1780_v17 }
  0x8e   : > { %924 = vmatmul.mubr.bf16.gmra.mrb[24].mxu1 %v1783_v18 }
  0x8f   : > { %933 = vmatprep.mubr.bf16.mxu1 %v1784_v19 }
  0x92   : > { %v397_v33 = vpop.permute.xlu0 %396  ;;  %v407_v49 = vpop.permute.xlu1 %406 }
  0x96   : > { %934 = vmatmul.mubr.bf16.gmra.mrb[28].mxu1 %v1787_v20  ;;  %v402_v39 = vpop.permute.xlu0 %401  ;;  %v412_v60 = vpop.permute.xlu1 %411 }
  0x9a   : > { %v417_v14 = vpop.permute.xlu0 %416  ;;  %v422_v18 = vpop.permute.xlu1 %421 }
 0x108   : > { %v978_v21 = vpop.f32.mrb[0].mxu0 }
 0x109   : > { %v980_v22 = vpop.f32.mrb[1].mxu0 }
 0x10a   : > { %v982_v23 = vpop.f32.mrb[2].mxu0 }
 0x10b   : > { %v984_v24 = vpop.f32.mrb[3].mxu0 }
 0x110   : > { %v988_v25 = vpop.f32.mrb[4].mxu0 }
 0x111   : > { %v990_v26 = vpop.f32.mrb[5].mxu0 }
 0x112   : > { %v992_v27 = vpop.f32.mrb[6].mxu0 }
 0x113   : > { %v994_v28 = vpop.f32.mrb[7].mxu0 }
 0x118   : > { %v998_v29 = vpop.f32.mrb[8].mxu0 }
 0x119   : > { %v2307_v30 = vpop.f32.mrb[9].mxu0 }
 0x11a   : > { %v2309_v31 = vpop.f32.mrb[10].mxu0 }
 0x11b   : > { %v2311_v32 = vpop.f32.mrb[11].mxu0 }
 0x120   : > { %v2313_v34 = vpop.f32.mrb[12].mxu0 }
 0x121   : > { %v2315_v35 = vpop.f32.mrb[13].mxu0 }
 0x122   : > { %v2317_v36 = vpop.f32.mrb[14].mxu0 }
 0x123   : > { %v2319_v37 = vpop.f32.mrb[15].mxu0 }
 0x128   : > { %v2321_v47 = vpop.f32.mrb[16].mxu0 }
 0x129   : > { %v2323_v51 = vpop.f32.mrb[17].mxu0 }
 0x12a   : > { %v2325_v53 = vpop.f32.mrb[18].mxu0 }
 0x12b   : > { %v2327_v55 = vpop.f32.mrb[19].mxu0 }
 0x130   : > { %v2329_v4 = vpop.f32.mrb[20].mxu0 }
 0x131   : > { %v865_v38 = vpop.f32.mrb[0].mxu1  ;;  %v2331_v8 = vpop.f32.mrb[21].mxu0 }
 0x132   : > { %v866_v40 = vadd.f32 %v865_v38, %v397_v33  ;;  %v867_v41 = vpop.f32.mrb[1].mxu1  ;;  %v2333_v10 = vpop.f32.mrb[22].mxu0 }
 0x133   : > { %v868_v42 = vadd.f32 %v867_v41, %v397_v33  ;;  %v869_v43 = vpop.f32.mrb[2].mxu1  ;;  %v2335_v12 = vpop.f32.mrb[23].mxu0 }
 0x134   : > { %v979_v44 = vadd.f32 %v978_v21, %v866_v40  ;;  %v870_v45 = vadd.f32 %v869_v43, %v402_v39  ;;  %v871_v46 = vpop.f32.mrb[3].mxu1 }
 0x135   : > { %v981_v48 = vadd.f32 %v980_v22, %v868_v42  ;;  %v872_v50 = vadd.f32 %v871_v46, %v402_v39 }
 0x136   : > { %v983_v52 = vadd.f32 %v982_v23, %v870_v45  ;;  %v1529_v59 = vmul.f32 -1.442695, %v979_v44  ;;  %v427_v45 = vpop.permute.xlu0 %426 }
 0x137   : > { %v985_v54 = vadd.f32 %v984_v24, %v872_v50  ;;  %v1530_v63 = vmul.f32 -1.442695, %v981_v48 }
 0x138   : > { %v1531_v5 = vmul.f32 -1.442695, %v983_v52  ;;  %1788 = vpow2.f32 %v1529_v59 }
 0x139   : > { %v875_v56 = vpop.f32.mrb[4].mxu1  ;;  %1790 = vpow2.f32 %v1530_v63  ;;  %v1532_v13 = vmul.f32 -1.442695, %v985_v54  ;;  %v432_v54 = vpop.permute.xlu1 %431 }
 0x13a   : > { %v876_v57 = vadd.f32 %v875_v56, %v407_v49  ;;  %v877_v58 = vpop.f32.mrb[5].mxu1  ;;  %1792 = vpow2.f32 %v1531_v5 }
 0x13b   : > { %v878_v61 = vadd.f32 %v877_v58, %v407_v49  ;;  %v879_v62 = vpop.f32.mrb[6].mxu1  ;;  %1794 = vpow2.f32 %v1532_v13 }
 0x13c   : > { %v989_v1 = vadd.f32 %v988_v25, %v876_v57  ;;  %v880_v2 = vadd.f32 %v879_v62, %v412_v60  ;;  %v881_v3 = vpop.f32.mrb[7].mxu1  ;;  %v2337_v25 = vpop.f32.mrb[24].mxu0 }
 0x13d   : > { %v991_v6 = vadd.f32 %v990_v26, %v878_v61  ;;  %v882_v7 = vadd.f32 %v881_v3, %v412_v60  ;;  %v2340_v33 = vpop.f32.mrb[25].mxu0 }
 0x13e   : > { %v993_v9 = vadd.f32 %v992_v27, %v880_v2  ;;  %v1533_v0 = vmul.f32 -1.442695, %v989_v1  ;;  %v2343_v40 = vpop.f32.mrb[26].mxu0 }
 0x13f   : > { %v995_v11 = vadd.f32 %v994_v28, %v882_v7  ;;  %v1534_v21 = vmul.f32 -1.442695, %v991_v6 }
 0x140   : > { %v1535_v26 = vmul.f32 -1.442695, %v993_v9  ;;  %1796 = vpow2.f32 %v1533_v0 }
 0x141   : > { %v885_v15 = vpop.f32.mrb[8].mxu1  ;;  %v1536_v38 = vmul.f32 -1.442695, %v995_v11  ;;  %1798 = vpow2.f32 %v1534_v21  ;;  %v442_v21 = vpop.permute.xlu1 %441 }
 0x142   : > { %v886_v16 = vadd.f32 %v885_v15, %v417_v14  ;;  %v887_v17 = vpop.f32.mrb[9].mxu1  ;;  %v1789_v44 = vpop.eup %1788  ;;  %1800 = vpow2.f32 %v1535_v26 }
 0x143   : > { %v888_v19 = vadd.f32 %v887_v17, %v417_v14  ;;  %v889_v20 = vpop.f32.mrb[10].mxu1  ;;  %v1791_v48 = vpop.eup %1790  ;;  %1802 = vpow2.f32 %v1536_v38 }
 0x144   : > { %v999_v22 = vadd.f32 %v998_v29, %v886_v16  ;;  %v890_v23 = vadd.f32 %v889_v20, %v422_v18  ;;  %v891_v24 = vpop.f32.mrb[11].mxu1  ;;  %v2346_v29 = vpop.f32.mrb[27].mxu0  ;;  %v1082_v62 = vadd.f32 1.0, %v1791_v48 }
 0x145   : > { %v1001_v27 = vadd.f32 %v2307_v30, %v888_v19  ;;  %v892_v28 = vadd.f32 %v891_v24, %v422_v18  ;;  %v2349_v61 = vpop.f32.mrb[28].mxu0  ;;  %v437_v15 = vpop.permute.xlu0 %436 }
 0x146   : > { %v1003_v39 = vadd.f32 %v2309_v31, %v890_v23  ;;  %v1537_v41 = vmul.f32 -1.442695, %v999_v22  ;;  %v1793_v31 = vpop.eup %1792  ;;  %v2352_v2 = vpop.f32.mrb[29].mxu0 }
 0x147   : > { %v1005_v42 = vadd.f32 %v2311_v32, %v892_v28  ;;  %v1538_v43 = vmul.f32 -1.442695, %v1001_v27  ;;  %v1081_v32 = vadd.f32 1.0, %v1789_v44  ;;  %v1795_v3 = vpop.eup %1794  ;;  %v1083_v5 = vadd.f32 1.0, %v1793_v31  ;;  %v2355_v7 = vpop.f32.mrb[30].mxu0 }
 0x148   : > { %v1539_v30 = vmul.f32 -1.442695, %v1003_v39  ;;  %1804 = vpow2.f32 %v1537_v41  ;;  %v2358_v11 = vpop.f32.mrb[31].mxu0 }
 0x149   : > { %v895_v46 = vpop.f32.mrb[12].mxu1  ;;  %v1540_v49 = vmul.f32 -1.442695, %v1005_v42  ;;  %1806 = vpow2.f32 %v1538_v43 }
 0x14a   : > { %v896_v50 = vadd.f32 %v895_v46, %v427_v45  ;;  %v897_v52 = vpop.f32.mrb[13].mxu1  ;;  %1808 = vpow2.f32 %v1539_v30  ;;  %v1797_v13 = vpop.eup %1796 }
 0x14b   : > { %v898_v56 = vadd.f32 %v897_v52, %v427_v45  ;;  %v899_v57 = vpop.f32.mrb[14].mxu1  ;;  %1810 = vpow2.f32 %v1540_v49  ;;  %v1799_v16 = vpop.eup %1798  ;;  %v1085_v20 = vadd.f32 1.0, %v1797_v13 }
 0x14c   : > { %v1009_v58 = vadd.f32 %v2313_v34, %v896_v50  ;;  %v900_v59 = vadd.f32 %v899_v57, %v432_v54  ;;  %v901_v60 = vpop.f32.mrb[15].mxu1  ;;  %1812 = vrcp.f32 %v1081_v32  ;;  %v1086_v39 = vadd.f32 1.0, %v1799_v16  ;;  %v447_v52 = vpop.permute.xlu0 %446 }
 0x14d   : > { %v1011_v63 = vadd.f32 %v2315_v35, %v898_v56  ;;  %v902_v1 = vadd.f32 %v901_v60, %v432_v54  ;;  %1814 = vrcp.f32 %v1082_v62  ;;  %v1084_v35 = vadd.f32 1.0, %v1795_v3 }
 0x14e   : > { %v1013_v6 = vadd.f32 %v2317_v36, %v900_v59  ;;  %v1541_v9 = vmul.f32 -1.442695, %v1009_v58  ;;  %1816 = vrcp.f32 %v1083_v5  ;;  %v1801_v36 = vpop.eup %1800  ;;  %v452_v58 = vpop.permute.xlu1 %451 }
 0x14f   : > { %v1015_v34 = vadd.f32 %v2319_v37, %v902_v1  ;;  %v1542_v14 = vmul.f32 -1.442695, %v1011_v63  ;;  %v1803_v23 = vpop.eup %1802  ;;  %v1087_v44 = vadd.f32 1.0, %v1801_v36 }
 0x150   : > { %v1543_v17 = vmul.f32 -1.442695, %v1013_v6  ;;  %1818 = vpow2.f32 %v1541_v9  ;;  %v1088_v46 = vadd.f32 1.0, %v1803_v23  ;;  %v457_v36 = vpop.permute.xlu0 %456 }
 0x151   : > { %v905_v0 = vpop.f32.mrb[16].mxu1  ;;  %1820 = vpow2.f32 %v1542_v14  ;;  %v1544_v24 = vmul.f32 -1.442695, %v1015_v34 }
 0x152   : > { %v906_v18 = vadd.f32 %v905_v0, %v437_v15  ;;  %v907_v19 = vpop.f32.mrb[17].mxu1  ;;  %v1805_v38 = vpop.eup %1804  ;;  %1822 = vrcp.f32 %v1084_v35 }
 0x153   : > { %v908_v22 = vadd.f32 %v907_v19, %v437_v15  ;;  %v909_v37 = vpop.f32.mrb[18].mxu1  ;;  %v1807_v43 = vpop.eup %1806  ;;  %1824 = vpow2.f32 %v1543_v17 }
 0x154   : > { %v1019_v26 = vadd.f32 %v2321_v47, %v906_v18  ;;  %v910_v27 = vadd.f32 %v909_v37, %v442_v21  ;;  %v911_v28 = vpop.f32.mrb[19].mxu1  ;;  %v1809_v30 = vpop.eup %1808  ;;  %1826 = vrcp.f32 %v1085_v20  ;;  %v1129_v47 = vadd.f32 1.0, %v1805_v38 }
 0x155   : > { %v1021_v41 = vadd.f32 %v2323_v51, %v908_v22  ;;  %v912_v42 = vadd.f32 %v911_v28, %v442_v21  ;;  %v1811_v49 = vpop.eup %1810  ;;  %1828 = vpow2.f32 %v1544_v24  ;;  %v1130_v50 = vadd.f32 1.0, %v1807_v43  ;;  %v462_v23 = vpop.permute.xlu1 %461 }
 0x156   : > { %v1023_v45 = vadd.f32 %v2325_v53, %v910_v27  ;;  %1830 = vrcp.f32 %v1086_v39  ;;  %v2364_v54 = vpop.eup %1812  ;;  %v1131_v51 = vadd.f32 1.0, %v1809_v30  ;;  %v1132_v53 = vadd.f32 1.0, %v1811_v49 }
 0x157   : > { %v1025_v48 = vadd.f32 %v2327_v55, %v912_v42  ;;  %1832 = vrcp.f32 %v1087_v44  ;;  %v2366_v32 = vpop.eup %1814  ;;  %v1545_v62 = vmul.f32 -1.442695, %v1019_v26  ;;  %v1546_v6 = vmul.f32 -1.442695, %v1021_v41 }
 0x158   : > { %1834 = vrcp.f32 %v1088_v46  ;;  %v2368_v60 = vpop.eup %1816  ;;  %v1547_v14 = vmul.f32 -1.442695, %v1023_v45 }
 0x159   : > { %v915_v31 = vpop.f32.mrb[20].mxu1  ;;  %1836 = vrcp.f32 %v1129_v47  ;;  %v1548_v0 = vmul.f32 -1.442695, %v1025_v48 }
 0x15a   : > { %v916_v56 = vadd.f32 %v915_v31, %v447_v52  ;;  %v917_v57 = vpop.f32.mrb[21].mxu1  ;;  %v1819_v5 = vpop.eup %1818  ;;  %1838 = vrcp.f32 %v1130_v50 }
 0x15b   : > { %v918_v59 = vadd.f32 %v917_v57, %v447_v52  ;;  %v919_v55 = vpop.f32.mrb[22].mxu1  ;;  %v1821_v13 = vpop.eup %1820  ;;  %1840 = vrcp.f32 %v1131_v51  ;;  %v1133_v17 = vadd.f32 1.0, %v1819_v5 }
 0x15c   : > { %v1029_v63 = vadd.f32 %v2329_v4, %v916_v56  ;;  %v920_v1 = vadd.f32 %v919_v55, %v452_v58  ;;  %v921_v3 = vpop.f32.mrb[23].mxu1  ;;  %v2373_v15 = vpop.eup %1822  ;;  %1842 = vrcp.f32 %v1132_v53  ;;  %v1134_v19 = vadd.f32 1.0, %v1821_v13 }
 0x15d   : > { %v1031_v9 = vadd.f32 %v2331_v8, %v918_v59  ;;  %v922_v34 = vadd.f32 %v921_v3, %v452_v58  ;;  %v1825_v4 = vpop.eup %1824  ;;  %1844 = vpow2.f32 %v1545_v62 }
 0x15e   : > { %v1033_v35 = vadd.f32 %v2333_v10, %v920_v1  ;;  %v2376_v18 = vpop.eup %1826  ;;  %1846 = vpow2.f32 %v1546_v6  ;;  %v1135_v37 = vadd.f32 1.0, %v1825_v4  ;;  %v1549_v27 = vmul.f32 -1.442695, %v1029_v63 }
 0x15f   : > { %v1035_v16 = vadd.f32 %v2335_v12, %v922_v34  ;;  %v1829_v20 = vpop.eup %1828  ;;  %1848 = vpow2.f32 %v1547_v14  ;;  %v1550_v30 = vmul.f32 -1.442695, %v1031_v9  ;;  %v1209_v34 = vld [vmem:[%s2398_s12] sm:$0xff] }
 0x160   : > { %v2378_v10 = vpop.eup %1830  ;;  %1850 = vpow2.f32 %v1548_v0  ;;  %v1136_v42 = vadd.f32 1.0, %v1829_v20  ;;  %v1551_v56 = vmul.f32 -1.442695, %v1033_v35  ;;  %v1211_v20 = vld [vmem:[%s2398_s12 + $0x10] sm:$0xff] }
 0x161   : > { %v925_v8 = vpop.f32.mrb[24].mxu1  ;;  %v2380_v26 = vpop.eup %1832  ;;  %1852 = vrcp.f32 %v1133_v17  ;;  %v1552_v59 = vmul.f32 -1.442695, %v1035_v16 }
 0x162   : > { %v926_v21 = vadd.f32 %v925_v8, %v457_v36  ;;  %v927_v22 = vpop.f32.mrb[25].mxu1  ;;  %v2383_v41 = vpop.eup %1834  ;;  %1854 = vrcp.f32 %v1134_v19  ;;  %v1210_v19 = vld [vmem:[%s2398_s12 + $0x8] sm:$0xff] }
 0x163   : > { %v928_v24 = vadd.f32 %v927_v22, %v457_v36  ;;  %v929_v12 = vpop.f32.mrb[26].mxu1  ;;  %v1837_v45 = vpop.eup %1836 }
 0x164   : > { %v1039_v28 = vadd.f32 %v2337_v25, %v926_v21  ;;  %v930_v38 = vadd.f32 %v929_v12, %v462_v23  ;;  %v931_v39 = vpop.f32.mrb[27].mxu1  ;;  %v2387_v48 = vpop.eup %1838  ;;  %v1213_v12 = vld [vmem:[%s2398_s12 + $0x20] sm:$0xff] }
 0x165   : > { %v1041_v43 = vadd.f32 %v2340_v33, %v928_v24  ;;  %v932_v44 = vadd.f32 %v931_v39, %v462_v23  ;;  %v2390_v49 = vpop.eup %1840  ;;  %v467_v33 = vpop.permute.xlu0 %466  ;;  %v1218_v24 = vmul.f32 %v2387_v48, %v1210_v19 }
 0x166   : > { %1856 = vtanh.f32 %v1039_v28  ;;  %v1043_v46 = vadd.f32 %v2343_v40, %v930_v38  ;;  %v2393_v47 = vpop.eup %1842  ;;  %v1219_v38 = vmul.f32 %v2390_v49, %v1211_v20 }
 0x167   : > { %1858 = vrcp.f32 %v1135_v37  ;;  %v1045_v25 = vadd.f32 %v2346_v29, %v932_v44  ;;  %v1845_v52 = vpop.eup %1844  ;;  %v472_v29 = vpop.permute.xlu1 %471  ;;  %v1212_v37 = vld [vmem:[%s2398_s12 + $0x18] sm:$0xff] }
 0x168   : > { %1860 = vpow2.f32 %v1549_v27  ;;  %v1847_v40 = vpop.eup %1846  ;;  %v1177_v3 = vadd.f32 1.0, %v1845_v52 }
 0x169   : > { %1862 = vrcp.f32 %v1136_v42  ;;  %v935_v50 = vpop.f32.mrb[28].mxu1  ;;  %v1849_v58 = vpop.eup %1848  ;;  %v1178_v13 = vadd.f32 1.0, %v1847_v40 }
 0x16a   : > { %1864 = vpow2.f32 %v1550_v30  ;;  %v936_v31 = vadd.f32 %v935_v50, %v467_v33  ;;  %v937_v51 = vpop.f32.mrb[29].mxu1  ;;  %v1851_v1 = vpop.eup %1850  ;;  %v1179_v36 = vadd.f32 1.0, %v1849_v58  ;;  %v1215_v50 = vld [vmem:[%s2398_s12 + $0x30] sm:$0xff] }
 0x16b   : > { %1866 = vtanh.f32 %v1041_v43  ;;  %v938_v57 = vadd.f32 %v937_v51, %v467_v33  ;;  %v939_v53 = vpop.f32.mrb[30].mxu1  ;;  %v1853_v9 = vpop.eup %1852  ;;  %v1180_v21 = vadd.f32 1.0, %v1851_v1  ;;  %v1220_v43 = vmul.f32 %v2393_v47, %v1212_v37  ;;  %v1214_v47 = vld [vmem:[%s2398_s12 + $0x28] sm:$0xff] }
 0x16c   : > { %1868 = vtanh.f32 %v1043_v46  ;;  %v1049_v55 = vadd.f32 %v2349_v61, %v936_v31  ;;  %v940_v62 = vadd.f32 %v939_v53, %v472_v29  ;;  %v941_v63 = vpop.f32.mrb[31].mxu1  ;;  %v2407_v35 = vpop.eup %1854 }
 0x16d   : > { %1870 = vtanh.f32 %v1045_v25  ;;  %v1051_v5 = vadd.f32 %v2352_v2, %v938_v57  ;;  %v942_v6 = vadd.f32 %v941_v63, %v472_v29  ;;  %v1217_v2 = vmul.f32 %v1837_v45, %v1209_v34  ;;  %v1216_v29 = vld [vmem:[%s2398_s12 + $0x38] sm:$0xff] }
 0x16e   : > { %1872 = vtanh.f32 %v1049_v55  ;;  %v1053_v14 = vadd.f32 %v2355_v7, %v940_v62  ;;  %v1222_v40 = vmul.f32 %v2407_v35, %v1214_v47 }
 0x16f   : > { %1874 = vpow2.f32 %v1551_v56  ;;  %v1055_v61 = vadd.f32 %v2358_v11, %v942_v6 }
 0x170   : > { %v1857_v0 = vpop.eup %1856  ;;  %1876 = vpow2.f32 %v1552_v59 }
 0x171   : > { %v2411_v16 = vpop.eup %1858  ;;  %1878 = vrcp.f32 %v1177_v3  ;;  %v1225_v4 = vmul.f32 %v1857_v0, %v2364_v54 }
 0x172   : > { %v1861_v17 = vpop.eup %1860  ;;  %1880 = vrcp.f32 %v1178_v13  ;;  %v1223_v53 = vmul.f32 %v2411_v16, %v1215_v50 }
 0x173   : > { %v2414_v7 = vpop.eup %1862  ;;  %v1233_v8 = vadd.f32 %v1225_v4, %v1217_v2  ;;  %1882 = vtanh.f32 %v1051_v5  ;;  %v1181_v23 = vadd.f32 1.0, %v1861_v17 }
 0x174   : > { %v1865_v11 = vpop.eup %1864  ;;  %1884 = vtanh.f32 %v1053_v14  ;;  %v1224_v3 = vmul.f32 %v2414_v7, %v1216_v29 }
 0x175   : > { %v1867_v22 = vpop.eup %1866  ;;  %1886 = vtanh.f32 %v1233_v8  ;;  %1265 = vst [vmem:[%s2421_s15] sm:$0xff] %v1233_v8  ;;  %v1182_v52 = vadd.f32 1.0, %v1865_v11 }
 0x176   : > { %v1869_v54 = vpop.eup %1868  ;;  %v1226_v27 = vmul.f32 %v1867_v22, %v2366_v32  ;;  %1888 = vtanh.f32 %v1055_v61  ;;  %v1221_v32 = vmul.f32 %v1853_v9, %v1213_v12 }
 0x177   : > { %v1871_v28 = vpop.eup %1870  ;;  %1890 = vrcp.f32 %v1179_v36  ;;  %v1227_v39 = vmul.f32 %v1869_v54, %v2368_v60 }
 0x178   : > { %v1873_v42 = vpop.eup %1872  ;;  %1892 = vrcp.f32 %v1180_v21  ;;  %v1234_v44 = vadd.f32 %v1226_v27, %v1218_v24  ;;  %v1228_v45 = vmul.f32 %v1871_v28, %v2373_v15 }
 0x179   : > { %v1875_v30 = vpop.eup %1874  ;;  %1894 = vrcp.f32 %v1181_v23  ;;  %v1235_v46 = vadd.f32 %v1227_v39, %v1219_v38  ;;  %v1229_v48 = vmul.f32 %v1873_v42, %v2376_v18 }
 0x17a   : > { %v1877_v25 = vpop.eup %1876  ;;  %1896 = vtanh.f32 %v1234_v44  ;;  %1266 = vst [vmem:[%s2421_s15 + $0x8] sm:$0xff] %v1234_v44  ;;  %v1236_v60 = vadd.f32 %v1228_v45, %v1220_v43  ;;  %v1183_v51 = vadd.f32 1.0, %v1875_v30 }
 0x17b   : > { %v1879_v49 = vpop.eup %1878  ;;  %1898 = vtanh.f32 %v1235_v46  ;;  %1267 = vst [vmem:[%s2421_s15 + $0x10] sm:$0xff] %v1235_v46  ;;  %v1237_v33 = vadd.f32 %v1229_v48, %v1221_v32  ;;  %v1184_v55 = vadd.f32 1.0, %v1877_v25 }
 0x17c   : > { %v1881_v15 = vpop.eup %1880  ;;  %1900 = vtanh.f32 %v1236_v60  ;;  %1268 = vst [vmem:[%s2421_s15 + $0x18] sm:$0xff] %v1236_v60 }
 0x17d   : > { %v1883_v31 = vpop.eup %1882  ;;  %1902 = vtanh.f32 %v1237_v33  ;;  %1269 = vst [vmem:[%s2421_s15 + $0x20] sm:$0xff] %v1237_v33 }
 0x17e   : > { %v1885_v18 = vpop.eup %1884  ;;  %v1230_v56 = vmul.f32 %v1883_v31, %v2378_v10  ;;  %1904 = vrcp.f32 %v1182_v52 }
 0x17f   : > { %v1887_v57 = vpop.eup %1886  ;;  %v1231_v58 = vmul.f32 %v1885_v18, %v2380_v26  ;;  %1906 = vrcp.f32 %v1183_v51 }
 0x180   : > { %v1889_v59 = vpop.eup %1888  ;;  %v1249_v62 = vmul.f32 %v1887_v57, %v1879_v49  ;;  %v1238_v63 = vadd.f32 %v1230_v56, %v1222_v40 }
 0x181   : > { %v1891_v1 = vpop.eup %1890  ;;  %v1239_v10 = vadd.f32 %v1231_v58, %v1223_v53  ;;  %v1232_v5 = vmul.f32 %v1889_v59, %v2383_v41 }
 0x182   : > { %v1893_v6 = vpop.eup %1892  ;;  %1257 = vst [vmem:[%s2449_s24] sm:$0xff] %v1249_v62  ;;  %1908 = vtanh.f32 %v1238_v63  ;;  %1270 = vst [vmem:[%s2421_s15 + $0x28] sm:$0xff] %v1238_v63 }
 0x183   : > { %v1895_v26 = vpop.eup %1894  ;;  %1910 = vtanh.f32 %v1239_v10  ;;  %1271 = vst [vmem:[%s2421_s15 + $0x30] sm:$0xff] %v1239_v10  ;;  %v1240_v9 = vadd.f32 %v1232_v5, %v1224_v3 }
 0x184   : > { %v1897_v41 = vpop.eup %1896  ;;  %1912 = vrcp.f32 %v1184_v55 }
 0x185   : > { %v1899_v34 = vpop.eup %1898  ;;  %v1250_v13 = vmul.f32 %v1897_v41, %v1881_v15  ;;  %1914 = vtanh.f32 %v1240_v9  ;;  %1272 = vst [vmem:[%s2421_s15 + $0x38] sm:$0xff] %v1240_v9 }
 0x186   : > { %v1901_v14 = vpop.eup %1900  ;;  %v1251_v35 = vmul.f32 %v1899_v34, %v1891_v1 }
 0x187   : > { %1929 = shalt.err (!%p1926_p5)
}
 0x188   : > { %s1930_s12 = scalar_lea.hbm %s2459_s29, 1024  ;;  %s1934_s25 = scalar_lea.hbm %s2562_s5, 2048 }
 0x189   : > { %p1931_p6 = scmp.ne.s32.totalorder %s2459_s29, %s1930_s12  ;;  %p1935_p10 = scmp.lt.u32.totalorder %s2459_s29, %s2562_s5 }
 0x18a   : > { %p1936_p11 = scmp.lt.u32.totalorder %s1934_s25, %s1930_s12  ;;  %p1938_p13 = scmp.lt.u32.totalorder %s1930_s12, %s2459_s29 }
 0x18b   : > { %p1932_p7 = pnand %p1931_p6, %p2103_p4 }
 0x18c   : > { %p1937_p12 = por %p1936_p11, %p1935_p10 }
 0x18d   : > { %p1933_p9 = pneg %p1932_p7 }
 0x18e   : > { %p1939_p0 = por %p1938_p13, %p1937_p12 }
 0x190   : > { %p1940_p1 = pnand %p1939_p0, %p1933_p9 }
 0x192   : > { %1943 = shalt.err (!%p1940_p1)
}
 0x193   : > { %s2030_s8 = smov 256   ;;  %s2031_s11 = smov 16   ;;  %v1903_v61 = vpop.eup %1902  ;;  %1258 = vst [vmem:[%s2449_s24 + $0x8] sm:$0xff] %v1250_v13  ;;  %v1252_v0 = vmul.f32 %v1901_v14, %v1893_v6  ;;  %1259 = vst [vmem:[%s2449_s24 + $0x10] sm:$0xff] %v1251_v35 }
 0x194   : > { %1630 = dma.vmem_to_hbm [thread:$0]  (%p2103_p4), %s2461_s17, 1024, %s2459_s29, %s1279_s7, %s2030_s8, %s2030_s8, %s2031_s11   ;;  %v1253_v16 = vmul.f32 %v1903_v61, %v1895_v26  ;;  %v1905_v2 = vpop.eup %1904 }
 0x195   : > { %1260 = vst [vmem:[%s2449_s24 + $0x18] sm:$0xff] %v1252_v0  ;;  %v1907_v4 = vpop.eup %1906  ;;  %s1294_s13 = sshll.u32 %s2449_s24, 4  ;;  %s2503_s7 = scalar_lea.hbm %s2561_s4, %s1562_s16  ;;  %s2505_s13 = int_to_ptr.vmem [resolvable:$true] %s1294_s13 }
 0x196   : > { %1261 = vst [vmem:[%s2449_s24 + $0x20] sm:$0xff] %v1253_v16  ;;  %v1909_v17 = vpop.eup %1908  ;;  %s1274_s12 = scalar_lea.sflag [#allocation3], %s2401_s9  ;;  %s1944_s14 = scalar_lea.vmem %s2505_s13, 1024 }
 0x197   : > { %v1911_v7 = vpop.eup %1910  ;;  %v1254_v19 = vmul.f32 %v1909_v17, %v1905_v2  ;;  %p1945_p2 = scmp.ne.s32.totalorder %s2505_s13, %s1944_s14  ;;  %s2032_s15 = smov [#allocation2]  }
 0x198   : > { %v1913_v36 = vpop.eup %1912  ;;  %v1255_v8 = vmul.f32 %v1911_v7, %v1907_v4  ;;  %s1948_s25 = sshll.u32 %s2032_s15, 4  ;;  %s1949_s25 = int_to_ptr.vmem [resolvable:$false] %s1948_s25 }
 0x199   : > { %v1915_v11 = vpop.eup %1914  ;;  %1262 = vst [vmem:[%s2449_s24 + $0x28] sm:$0xff] %v1254_v19  ;;  %p1946_p3 = pnand %p1945_p2, %p2103_p4  ;;  %s1950_s21 = scalar_lea.vmem %s1949_s25, 2048 }
 0x19a   : > { %1263 = vst [vmem:[%s2449_s24 + $0x30] sm:$0xff] %v1255_v8  ;;  %v1256_v20 = vmul.f32 %v1915_v11, %v1913_v36  ;;  %p1951_p6 = scmp.lt.s32.totalorder %s2505_s13, %s1949_s25  ;;  %p1952_p7 = scmp.lt.s32.totalorder %s1950_s21, %s1944_s14 }
 0x19b   : > { %p1947_p5 = pneg %p1946_p3 }
 0x19c   : > { %1264 = vst [vmem:[%s2449_s24 + $0x38] sm:$0xff] %v1256_v20  ;;  %p1953_p9 = por %p1952_p7, %p1951_p6 }
 0x19e   : > { %p1954_p10 = pnand %p1953_p9, %p1947_p5 }
 0x1a0   : > { %1957 = shalt.err (!%p1954_p10)
}
 0x1a1   : > { %s1958_s16 = scalar_lea.hbm %s2503_s7, 1024  ;;  %s1962_s10 = scalar_lea.hbm %s2561_s4, 2048 }
 0x1a2   : > { %p1959_p11 = scmp.ne.s32.totalorder %s2503_s7, %s1958_s16  ;;  %p1963_p0 = scmp.lt.u32.totalorder %s2503_s7, %s2561_s4 }
 0x1a3   : > { %p1964_p1 = scmp.lt.u32.totalorder %s1962_s10, %s1958_s16  ;;  %p1966_p3 = scmp.lt.u32.totalorder %s1958_s16, %s2503_s7 }
 0x1a4   : > { %p1960_p12 = pnand %p1959_p11, %p2103_p4 }
 0x1a5   : > { %p1965_p2 = por %p1964_p1, %p1963_p0 }
 0x1a6   : > { %p1961_p13 = pneg %p1960_p12 }
 0x1a7   : > { %p1967_p5 = por %p1966_p3, %p1965_p2 }
 0x1a9   : > { %p1968_p6 = pnand %p1967_p5, %p1961_p13 }
 0x1ab   : > { %1971 = shalt.err (!%p1968_p6)
}
 0x1ac   : > { %1629 = dma.vmem_to_hbm [thread:$0]  (%p2103_p4), %s2505_s13, 1024, %s2503_s7, %s1274_s12, %s2030_s8, %s2030_s8, %s2031_s11  }
 0x1ad PF: > { %p1640_p7 = scmp.ge.s32.totalorder %s2026_s23, 2  ;;  %s1327_s14 = sand.u32 1, %s2006_s18  }
 0x1ae   : > { %s1328_s15 = scalar_lea.sflag [#allocation3], %s1327_s14 }
 0x1af   : > { %p1634_p9 = pnand %p1640_p7, %p2110_p8 }
 0x1b1   : > { %1997 = dma.done.wait (!%p1634_p9), %s1328_s15, 1024  }
 0x1b2   : > { %1999 = vsyncadd (!%p1634_p9), %s1328_s15, 4294966272  ;;  %s1337_s28 = scalar_lea.sflag [#allocation5], %s1327_s14 }
 0x1b3   : > { %2001 = dma.done.wait (!%p1634_p9), %s1337_s28, 1024  }
 0x1b4   : > { %2003 = vsyncadd (!%p1634_p9), %s1337_s28, 4294966272  ;;  %s22_s23 = sadd.s32 1, %s2026_s23   ;;  %s2565_s18 = smov %s2010_s19 }
 0x1b5   : > { %p19_p10 = scmp.ge.s32.totalorder %s22_s23, 4   ;;  %s2566_s19 = smov %s2014_s20 }
 0x1b6   : > { %s2567_s20 = smov %s2116_s6  ;;  %s2568_s21 = smov %s2022_s22 }
 0x1b7   : > { %s2569_s22 = smov %s2571_s26  ;;  %21 = sbr.rel (!%p19_p10) target bundleno = 6 (0x6), region = 91 }
 0x1be   :  { %1342 = vsyncpa [#allocation3], 1 }
 0x1bf   :  { %1344 = vsyncpa [#allocation3 + $0x1], 1 }
 0x1c0   :  { %1345 = vsyncpa [#allocation5], 1 }
 0x1c1   :  { %1347 = vsyncpa [#allocation5 + $0x1], 1 }

</bundles_post_ra>
